<compile_context>
chip_gen: v5e
topology: v5e:2x2
jax: 0.10.0
libtpu: 0.0.40
codegen_flags: <defaults>
</compile_context>

<pallas_src>
import jax
import jax.numpy as jnp
from jax import lax
from jax.experimental import pallas as pl
from jax.experimental.pallas import tpu as pltpu


def nil_reg_kernel(a_ref, logits_ref, o_ref):
    """One grid step = one block of B batch elements.

    a_ref:      (B, m, m)  bf16 dense adjacency (with self loops)
    logits_ref: (B, m, T)  raw logits
    o_ref:      (8, 128)   this step's partial-sum tile (lane-dense output)
    """
    A = a_ref[...].astype(jnp.float32)                        # 0/1/2 -> exact cast
    y = jax.nn.sigmoid(logits_ref[...].astype(jnp.float32))   # (B, m, T)
    T = y.shape[-1]

    # Full-T batched matmul keeps the MXU operands lane-dense (no :-1 copy).
    pred = jnp.einsum("bij,bjt->bit", A, y,
                      preferred_element_type=jnp.float32)     # (B, m, T)

    # y_next[..., t] == y[..., t+1]; wrap-around column masked out below.
    # pltpu.roll runs on the XLU slot instead of materializing a shifted copy.
    y_next = pltpu.roll(y, T - 1, axis=2)
    t_idx = lax.broadcasted_iota(jnp.int32, y.shape, 2)
    diff = jnp.where(t_idx < T - 1, y_next - pred, jnp.float32(0.0))
    partial = jnp.sum(jnp.maximum(diff, jnp.float32(0.0)))    # one reduce per B-block

    # Each grid step owns its own (8, 128) output tile -> no resident scalar
    # accumulator, no cross-step RMW, safe with "parallel" grid semantics.
    r = lax.broadcasted_iota(jnp.int32, (8, 128), 0)
    c = lax.broadcasted_iota(jnp.int32, (8, 128), 1)
    o_ref[...] = jnp.where((r == 0) & (c == 0), partial, jnp.float32(0.0))


def nil_with_logits_reg(logits, A_coo, *, num_nodes, block_batches=None):
    """JAX/Pallas equivalent of NILWithLogitsReg.forward(logits, A_coo, num_nodes=m)."""
    m = num_nodes
    bs = logits.shape[0] // m
    T = logits.shape[1]

    # --- setup glue (plain JAX): COO -> dense per-batch adjacency (+ self loops) ---
    # Note: .set(1.0) matches the PyTorch loop `A[i][j] = 1` (duplicates stay 1).
    edges = A_coo.reshape((bs, 2, -1)) % m
    eye = jnp.eye(m, dtype=jnp.float32)

    def build_adj(e):  # e: (2, E)
        return jnp.zeros((m, m), jnp.float32).at[e[0], e[1]].set(1.0) + eye

    A = jax.vmap(build_adj)(edges).astype(jnp.bfloat16)   # values 0/1/2: exact in bf16
    y = logits.reshape(bs, m, T)                           # keep caller dtype

    # --- pick batch-block size B (amortize per-grid-step fixed overhead) ---
    if block_batches is None:
        per_batch = m * m * A.dtype.itemsize + m * T * y.dtype.itemsize
        budget = 8 * 1024 * 1024   # conservative: fits default scoped VMEM, double-buffered, on v5e/v6e/v7x
        block_batches = max(1, min(bs, budget // max(per_batch, 1)))
    B = int(block_batches)

    # Pad the batch to a multiple of B.  Identity adjacency + zero logits give
    # y_hat = 0.5, pred = 0.5 -> diff = 0 exactly, so padding contributes 0.
    pad = (-bs) % B
    if pad:
        A = jnp.concatenate(
            [A, jnp.broadcast_to(eye.astype(A.dtype), (pad, m, m))], axis=0)
        y = jnp.concatenate([y, jnp.zeros((pad, m, T), y.dtype)], axis=0)
    G = (bs + pad) // B

    out = pl.pallas_call(
        nil_reg_kernel,
        out_shape=jax.ShapeDtypeStruct((8, G * 128), jnp.float32),
        grid_spec=pltpu.PrefetchScalarGridSpec(
            num_scalar_prefetch=0,
            grid=(G,),
            in_specs=[
                pl.BlockSpec((B, m, m), lambda g: (g, 0, 0)),
                pl.BlockSpec((B, m, T), lambda g: (g, 0, 0)),
            ],
            out_specs=pl.BlockSpec((8, 128), lambda g: (0, g)),
        ),
        compiler_params=pltpu.CompilerParams(
            dimension_semantics=("parallel",),   # per-step private outputs -> race-free
        ),
        cost_estimate=pl.CostEstimate(
            flops=2 * (bs + pad) * m * m * T,
            transcendentals=(bs + pad) * m * T,
            bytes_accessed=int(A.size * A.dtype.itemsize
                               + y.size * y.dtype.itemsize
                               + G * 8 * 128 * 4),
        ),
    )(A, y)

    # Final tiny reduction over the per-step partial tiles (zeros except [0, 0]).
    return jnp.sum(out)


def _reference(logits, A_coo, *, num_nodes):
    """Pure-JAX reference mirroring the PyTorch module (block-diag form)."""
    m = num_nodes
    bs = logits.shape[0] // m
    y_hat = jax.nn.sigmoid(logits.astype(jnp.float32))          # (bs*m, T)
    A_coo = A_coo.reshape((bs, 2, -1)) % m
    eye = jnp.eye(m, dtype=jnp.float32)
    blocks = [
        jnp.zeros((m, m), jnp.float32).at[A_coo[b, 0], A_coo[b, 1]].set(1.0) + eye
        for b in range(bs)
    ]
    A = jax.scipy.linalg.block_diag(*blocks)                    # (bs*m, bs*m)
    diff = y_hat[:, 1:] - A @ y_hat[:, :-1]
    return jnp.sum(jnp.maximum(diff, 0.0))


if __name__ == "__main__":
    key = jax.random.PRNGKey(0)
    k_logits, k_edges = jax.random.split(key)

    # batch=5, nodes/graph=8, time steps=16, edges/graph=12
    bs, m, T, E = 5, 8, 16, 12
    logits = jax.random.normal(k_logits, (bs * m, T), dtype=jnp.float32)
    A_coo = jax.random.randint(k_edges, (bs, 2, E), 0, bs * m, dtype=jnp.int32)

    # block_batches=2 -> grid of 3 steps (exercises multi-block path + padding).
    reg = nil_with_logits_reg(logits, A_coo, num_nodes=m, block_batches=2)
    reg = jax.block_until_ready(reg)

    ref = jax.block_until_ready(_reference(logits, A_coo, num_nodes=m))
    assert jnp.allclose(reg, ref, rtol=1e-4, atol=1e-4), (reg, ref)

    print("KERNEL_OK")
</pallas_src>

<mosaic_0001>
module attributes {stable_mosaic.version = 11 : i64} {
  func.func @nil_reg_kernel(%arg0: i32, %arg1: memref<2x8x8xbf16, #tpu.memory_space<vmem>>, %arg2: memref<2x8x16xf32, #tpu.memory_space<vmem>>, %arg3: memref<8x128xf32, #tpu.memory_space<vmem>>) attributes {dimension_semantics = [#tpu.dimension_semantics<parallel>], iteration_bounds = array<i64: 3>, scalar_prefetch = 0 : i64, scratch_operands = 0 : i64, tpu.core_type = #tpu.core_type<tc>, window_params = [{transform_indices = @transform_0, window_bounds = array<i64: 2, 8, 8>}, {transform_indices = @transform_1, window_bounds = array<i64: 2, 8, 16>}, {transform_indices = @transform_2, window_bounds = array<i64: 8, 128>}]} {
    %c0 = arith.constant 0 : index
    %c0_0 = arith.constant 0 : index
    %c0_1 = arith.constant 0 : index
    %0 = vector.load %arg1[%c0, %c0_0, %c0_1] : memref<2x8x8xbf16, #tpu.memory_space<vmem>>, vector<2x8x8xbf16>
    %1 = arith.extf %0 : vector<2x8x8xbf16> to vector<2x8x8xf32>
    %c0_2 = arith.constant 0 : index
    %c0_3 = arith.constant 0 : index
    %c0_4 = arith.constant 0 : index
    %2 = vector.load %arg2[%c0_2, %c0_3, %c0_4] : memref<2x8x16xf32, #tpu.memory_space<vmem>>, vector<2x8x16xf32>
    %3 = arith.negf %2 : vector<2x8x16xf32>
    %4 = math.exp %3 : vector<2x8x16xf32>
    %cst = arith.constant 1.000000e+00 : f32
    %5 = vector.broadcast %cst : f32 to vector<2x8x16xf32>
    %6 = arith.addf %5, %4 : vector<2x8x16xf32>
    %7 = arith.divf %5, %6 : vector<2x8x16xf32>
    "tpu.trace_start"() <{level = 10 : i32, message = "bij,bjt->bit"}> : () -> ()
    %cst_5 = arith.constant dense<0.000000e+00> : vector<2x8x16xf32>
    %8 = tpu.matmul %1, %7, %cst_5 {dimension_numbers = #tpu.dot_dimension_numbers<[2], [1], [1], [2], [0, 0, 0, 1, 1, 2], [0], [0]>} : vector<2x8x8xf32>, vector<2x8x16xf32>, vector<2x8x16xf32> -> vector<2x8x16xf32>
    %c15_i32 = arith.constant 15 : i32
    "tpu.trace_stop"() : () -> ()
    %9 = tpu.dynamic_rotate %7 by %c15_i32 dim 2 : vector<2x8x16xf32>, i32 -> vector<2x8x16xf32>
    %10 = tpu.iota {dimensions = array<i32: 2>} : vector<2x8x16xi32>
    %c15_i32_6 = arith.constant 15 : i32
    %11 = vector.broadcast %c15_i32_6 : i32 to vector<2x8x16xi32>
    %12 = arith.cmpi slt, %10, %11 : vector<2x8x16xi32>
    %13 = arith.subf %9, %8 : vector<2x8x16xf32>
    %cst_7 = arith.constant 0.000000e+00 : f32
    %14 = vector.broadcast %cst_7 : f32 to vector<2x8x16xf32>
    %15 = arith.select %12, %13, %14 : vector<2x8x16xi1>, vector<2x8x16xf32>
    %cst_8 = arith.constant 0.000000e+00 : f32
    %16 = vector.broadcast %cst_8 : f32 to vector<2x8x16xf32>
    %17 = arith.maximumf %15, %16 : vector<2x8x16xf32>
    %18 = vector.shape_cast %17 : vector<2x8x16xf32> to vector<1x2x8x16xf32>
    %cst_9 = arith.constant dense<0.000000e+00> : vector<1xf32>
    %19 = vector.multi_reduction <add>, %18, %cst_9 [1, 2, 3] : vector<1x2x8x16xf32> to vector<1xf32>
    %20 = vector.shape_cast %19 : vector<1xf32> to vector<1x1x1x1xf32>
    %21 = vector.extract %20[0, 0, 0, 0] : f32 from vector<1x1x1x1xf32>
    %22 = tpu.iota {dimensions = array<i32: 0>} : vector<8x128xi32>
    %23 = tpu.iota {dimensions = array<i32: 1>} : vector<8x128xi32>
    %c0_i32 = arith.constant 0 : i32
    %24 = vector.broadcast %c0_i32 : i32 to vector<8x128xi32>
    %25 = arith.cmpi eq, %22, %24 : vector<8x128xi32>
    %c0_i32_10 = arith.constant 0 : i32
    %26 = vector.broadcast %c0_i32_10 : i32 to vector<8x128xi32>
    %27 = arith.cmpi eq, %23, %26 : vector<8x128xi32>
    %28 = arith.andi %25, %27 : vector<8x128xi1>
    %cst_11 = arith.constant 0.000000e+00 : f32
    %29 = vector.broadcast %21 : f32 to vector<8x128xf32>
    %30 = vector.broadcast %cst_11 : f32 to vector<8x128xf32>
    %31 = arith.select %28, %29, %30 : vector<8x128xi1>, vector<8x128xf32>
    %c0_12 = arith.constant 0 : index
    %c0_13 = arith.constant 0 : index
    %32 = vector.load %arg3[%c0_12, %c0_13] : memref<8x128xf32, #tpu.memory_space<vmem>>, vector<8x128xf32>
    tpu.vector_store %arg3[%c0_12, %c0_13], %31 {strides = array<i32>} : memref<8x128xf32, #tpu.memory_space<vmem>>, vector<8x128xf32>,
    return
  }
  func.func @transform_0(%arg0: i32) -> (i32, i32, i32) {
    %c0_i32 = arith.constant 0 : i32
    %c0_i32_0 = arith.constant 0 : i32
    %c0_i32_1 = arith.constant 0 : i32
    return %arg0, %c0_i32, %c0_i32_0 : i32, i32, i32
  }
  func.func @transform_1(%arg0: i32) -> (i32, i32, i32) {
    %c0_i32 = arith.constant 0 : i32
    %c0_i32_0 = arith.constant 0 : i32
    %c0_i32_1 = arith.constant 0 : i32
    return %arg0, %c0_i32, %c0_i32_0 : i32, i32, i32
  }
  func.func @transform_2(%arg0: i32) -> (i32, i32) {
    %c0_i32 = arith.constant 0 : i32
    %c0_i32_0 = arith.constant 0 : i32
    return %c0_i32, %arg0 : i32, i32
  }
}

</mosaic_0001>

<bundles_post_ra>
// kernel: tpu_custom_call.1
= control target key start
LH: loop header
LB: loop body
LE: loop exit
PB: predicated region body
PF: predicated region fallthrough
CT: control target
= control target key end

     0   :  { %7 = vsyncpa [#allocation3], 0  ;;  %s888_s0 = inlined_call_operand.hbm [shape: bf16[6,8,8], index: 0, kind: input, shape index: {}]   ;;  %s889_s1 = inlined_call_operand.hbm [shape: f32[6,8,16], index: 1, kind: input, shape index: {}]   ;;  %s890_s2 = inlined_call_operand.hbm [shape: f32[8,384], index: 2, kind: output, shape index: {}]  }
   0x1   :  { %9 = vsyncpa [#allocation3 + $0x1], 0 }
   0x2   :  { %10 = vsyncpa [#allocation6], 0 }
   0x3   :  { %12 = vsyncpa [#allocation6 + $0x1], 0 }
   0x4   :  { %13 = vsyncpa [#allocation4], 0 }
   0x5   :  { %15 = vsyncpa [#allocation4 + $0x1], 0  ;;  %s716_s9 = smov 0   ;;  %s718_s10 = smov 0  }
   0x6   :  { %s720_s11 = smov 0   ;;  %s722_s12 = smov 0  }
   0x7 LB: > { %s737_s13 = sadd.s32 4294967295, %s692_s12   ;;  %s467_s14 = sadd.s32 4294967294, %s692_s12   ;;  %s692_s12 = sphi %s722_s12, %s900_s12   ;;  %s688_s11 = sphi %s720_s11, %s899_s11   ;;  %s684_s10 = sphi %s718_s10, %s898_s10   ;;  %s680_s9 = sphi %s716_s9, %s897_s9  }
   0x8   : > { %s741_s15 = sadd.s32 1, %s692_s12   ;;  %s28_s16 = sadd.s32 1, %s688_s11 }
   0x9   : > { %s25_s17 = ssub.s32 %s692_s12, %s741_s15  ;;  %p35_p0 = scmp.ne.s32.totalorder %s688_s11, %s684_s10 }
   0xa   : > { %p26_p1 = scmp.eq.s32.totalorder %s25_s17, 0  ;;  %p36_p2 = scmp.eq.s32.totalorder %s692_s12, 0 }
   0xb   : > { %p41_p3 = scmp.ne.s32.totalorder %s684_s10, %s680_s9  ;;  %p42_p4 = scmp.eq.s32.totalorder %s737_s13, 0 }
   0xc   : > { %s753_s18 = scalar_select %p26_p1, %s688_s11, %s28_s16  }
   0xd   : > { %p755_p5 = por %p36_p2, %p35_p0  ;;  %p759_p6 = por %p42_p4, %p41_p3 }
   0xe   : > { %p91_p7 = scmp.eq.s32.totalorder %s737_s13, 2  ;;  %p97_p8 = scmp.eq.s32.totalorder %s467_s14, 2 }
   0xf   : > { %p513_p9 = scmp.lt.s32.totalorder %s692_s12, 3  ;;  %s774_s23 = sand.u32 1, %s688_s11  }
  0x10   : > { %p765_p10 = por %p91_p7, %p35_p0  ;;  %p769_p11 = por %p97_p8, %p41_p3 }
  0x11   : > { %s488_s24 = sshll.u32 %s692_s12, 3  ;;  %s470_s25 = sshll.u32 %s774_s23, 3 }
  0x12   : > { %s126_s28 = scalar_lea.hbm %s888_s0, %s488_s24  ;;  %s121_s30 = scalar_lea.vmem [#allocation2], %s470_s25 }
  0x13   : > { %s127_s29 = sshll.u32 %s126_s28, 4  ;;  %s129_s3 = sshll.u32 %s121_s30, 4  ;;  %s128_s29 = int_to_ptr.hbm [resolvable:$true] %s127_s29  ;;  %s130_s3 = int_to_ptr.vmem [resolvable:$true] %s129_s3 }
  0x14   : > { %p783_p12 = pnand %p513_p9, %p755_p5  ;;  %p476_p13 = scmp.ge.s32.totalorder %s692_s12, 1 }
  0x15   : > { %p159_p0 = scmp.lt.s32.totalorder %s692_s12, 4  ;;  %s118_s5 = scalar_lea.sflag [#allocation3], %s774_s23 }
  0x16   : > { %s562_s6 = sshra.s32 %s128_s29, 4  ;;  %p566_p2 = pneg %p783_p12  ;;  %s563_s6 = int_to_ptr.hbm [resolvable:$true] %s562_s6 }
  0x17   : > { %s564_s7 = scalar_lea.hbm %s563_s6, 8  ;;  %s569_s16 = scalar_lea.hbm %s888_s0, 24 }
  0x18   : > { %p565_p1 = scmp.ne.s32.totalorder %s563_s6, %s564_s7  ;;  %p570_p5 = scmp.lt.s32.totalorder %s563_s6, %s888_s0 }
  0x19   : > { %p571_p7 = scmp.lt.s32.totalorder %s569_s16, %s564_s7 }
  0x1a   : > { %p567_p3 = pnand %p566_p2, %p565_p1 }
  0x1b   : > { %p572_p8 = por %p571_p7, %p570_p5 }
  0x1c   : > { %p568_p4 = pneg %p567_p3 }
  0x1e   : > { %p573_p9 = pnand %p572_p8, %p568_p4 }
  0x20   : > { %576 = shalt.err (!%p573_p9)
}
  0x21   : > { %s694_s24 = smov 64   ;;  %s695_s25 = smov 4  }
  0x22   : > { %505 = dma.hbm_to_vmem [thread:$0]  (!%p783_p12), %s128_s29, 128, %s130_s3, %s118_s5, %s694_s24, %s694_s24, %s695_s25  }
  0x23   : > { %p807_p1 = pnand %p476_p13, %p159_p0  ;;  %s473_s27 = sshll.u32 %s774_s23, 4 }
  0x24   : > { %s489_s28 = sshll.u32 %s692_s12, 4  ;;  %s143_s14 = scalar_lea.vmem [#allocation5], %s473_s27 }
  0x25   : > { %s148_s7 = scalar_lea.hbm %s889_s1, %s489_s28  ;;  %s151_s16 = sshll.u32 %s143_s14, 4  ;;  %s152_s16 = int_to_ptr.vmem [resolvable:$true] %s151_s16 }
  0x26   : > { %s149_s8 = sshll.u32 %s148_s7, 4  ;;  %s140_s17 = scalar_lea.sflag [#allocation6], %s774_s23  ;;  %s150_s8 = int_to_ptr.hbm [resolvable:$true] %s149_s8 }
  0x27   : > { %s592_s19 = sshra.s32 %s150_s8, 4  ;;  %s599_s24 = scalar_lea.hbm %s889_s1, 48  ;;  %s593_s19 = int_to_ptr.hbm [resolvable:$true] %s592_s19 }
  0x28   : > { %s594_s29 = scalar_lea.hbm %s593_s19, 16  ;;  %p600_p4 = scmp.lt.s32.totalorder %s593_s19, %s889_s1 }
  0x29   : > { %p595_p3 = scmp.ne.s32.totalorder %s593_s19, %s594_s29  ;;  %p601_p5 = scmp.lt.s32.totalorder %s599_s24, %s594_s29 }
  0x2b   : > { %p597_p13 = pnand %p595_p3, %p566_p2  ;;  %p602_p7 = por %p601_p5, %p600_p4 }
  0x2d   : > { %p598_p0 = pneg %p597_p13 }
  0x2f   : > { %p603_p8 = pnand %p602_p7, %p598_p0 }
  0x31   : > { %606 = shalt.err (!%p603_p8)
}
  0x32   : > { %s696_s23 = smov 128   ;;  %s697_s27 = smov 8  }
  0x33   : > { %508 = dma.hbm_to_vmem [thread:$0]  (!%p783_p12), %s150_s8, 256, %s152_s16, %s140_s17, %s696_s23, %s696_s23, %s697_s27  }
  0x34   : > { %163 = sbr.rel (%p807_p1) target bundleno = 636 (0x27c), region = 28  ;;  %s831_s30 = sand.u32 (!%p807_p1), 1, %s684_s10  }
  0x35   : > { %s477_s6 = sshll.u32 (!%p807_p1), %s831_s30, 3  ;;  %s166_s7 = scalar_lea.sflag (!%p807_p1), [#allocation3], %s831_s30 }
  0x36   : > { %s837_s14 = scalar_lea.vmem (!%p807_p1), [#allocation2], %s477_s6 }
  0x39   : > { %667 = dma.done.wait (%p759_p6), %s166_s7, 128  }
  0x3a   : > { %669 = vsyncadd (%p759_p6), %s166_s7, 4294967168  ;;  %s478_s4 = sshll.u32 %s831_s30, 4  ;;  %s176_s26 = scalar_lea.sflag [#allocation6], %s831_s30 }
  0x3b   : > { %s179_s8 = scalar_lea.vmem [#allocation5], %s478_s4 }
  0x3c   : > { %671 = dma.done.wait (%p759_p6), %s176_s26, 256  }
  0x3d   : > { %673 = vsyncadd (%p759_p6), %s176_s26, 4294967040  ;;  %v212_v0 = vld [vmem:[%s179_s8] sm:$0xff]  ;;  %v213_v1 = vld [vmem:[%s179_s8 + $0x8] sm:$0xff]  ;;  %vm252_vm8 = vcmask 64512   ;;  %s698_s20 = smov 16   ;;  %vm299_vm9 = vcmask 1047680   ;;  %v312_v45 = vlaneseq }
  0x3e   : > { %v480_v2 = vmul.f32 -1.442695, %v212_v0  ;;  %v481_v3 = vmul.f32 -1.442695, %v213_v1  ;;  %v491_v19 = vld [vmem:[%s837_s14] sm:$0xff]   ;;  %s699_s16 = smov 1  }
  0x3f   : > { %v492_v25 = vunpack.c.l.bf16 %v491_v19  ;;  %v493_v27 = vunpack.c.h.bf16 %v491_v19  ;;  %s700_s17 = smov 127   ;;  %v313_v46 = vand.u32 127, %v312_v45  ;;  %vm337_vm11 = vcmask 130048   ;;  %s485_s19 = sshll.u32 %s737_s13, 3 }
  0x40   : > { %554 = vpow2.f32 %v480_v2  ;;  %v351_v63 = vshrl.u32 %v312_v45, 7  ;;  %s369_s5 = scalar_lea.hbm %s890_s2, %s485_s19  ;;  %s205_s24 = scalar_lea.vmem [#allocation7], %s477_s6 }
  0x41   : > { %556 = vpow2.f32 %v481_v3  ;;  %vm314_vm10 = vcmp.lt.s32.totalorder %v313_v46, 15  ;;  %vm353_vm13 = vcmp.eq.s32.totalorder %v313_v46, 0  ;;  %s371_s25 = sshll.u32 %s205_s24, 4  ;;  %s373_s28 = sshll.u32 %s369_s5, 4  ;;  %s372_s25 = int_to_ptr.vmem [resolvable:$true] %s371_s25  ;;  %s374_s28 = int_to_ptr.hbm [resolvable:$true] %s373_s28 }
  0x42   : > { %vm352_vm12 = vcmp.eq.s32.totalorder %v351_v63, 0  ;;  %s359_s27 = scalar_lea.sflag [#allocation4], %s831_s30  ;;  %s636_s13 = sshra.s32 %s374_s28, 4  ;;  %s637_s13 = int_to_ptr.hbm [resolvable:$true] %s636_s13 }
  0x43   : > { %vm354_vm14 = vmand %vm352_vm12, %vm353_vm13  ;;  %s638_s7 = scalar_lea.hbm %s637_s13, 8  ;;  %s642_s6 = scalar_lea.hbm %s890_s2, 24 }
  0x44   : > { %p639_p6 = scmp.ne.s32.totalorder %s637_s13, %s638_s7  ;;  %p643_p9 = scmp.lt.s32.totalorder %s637_s13, %s890_s2 }
  0x45   : > { %p644_p1 = scmp.lt.s32.totalorder %s642_s6, %s638_s7 }
  0x46   : > { %v555_v4 = vpop.eup %554  ;;  %p640_p12 = pnand %p639_p6, %p765_p10 }
  0x47   : > { %v557_v5 = vpop.eup %556  ;;  %v220_v6 = vadd.f32 1.0, %v555_v4  ;;  %p645_p3 = por %p644_p1, %p643_p9 }
  0x48   : > { %v221_v7 = vadd.f32 1.0, %v557_v5  ;;  %p641_p2 = pneg %p640_p12 }
  0x49   : > { %558 = vrcp.f32 %v220_v6  ;;  %vm227_vm0 = vweird.f32 %v220_v6  ;;  %v233_v11 = vand.u32 2147483648, %v220_v6  ;;  %v231_v14 = vand.u32 2147483647, %v220_v6 }
  0x4a   : > { %560 = vrcp.f32 %v221_v7  ;;  %v248_v15 = vand.u32 2147483648, %v221_v7  ;;  %vm242_vm2 = vweird.f32 %v221_v7  ;;  %v246_v17 = vand.u32 2147483647, %v221_v7  ;;  %p646_p13 = pnand %p645_p3, %p641_p2 }
  0x4b   : > { %v234_v20 = vor.u32 1.1754944e-38, %v233_v11  ;;  %vm232_vm5 = vcmp.eq.f32.partialorder %v231_v14, 8.507059e+37 }
  0x4c   : > { %v249_v23 = vor.u32 1.1754944e-38, %v248_v15  ;;  %vm247_vm7 = vcmp.eq.f32.partialorder %v246_v17, 8.507059e+37 }
  0x4f   : > { %v559_v8 = vpop.eup %558 }
  0x50   : > { %v561_v9 = vpop.eup %560  ;;  %v223_v10 = vmul.f32 %v559_v8, %v220_v6  ;;  %vm228_vm1 = vweird.f32 %v559_v8 }
  0x51   : > { %v238_v12 = vmul.f32 %v561_v9, %v221_v7  ;;  %vm243_vm3 = vweird.f32 %v561_v9  ;;  %vm229_vm4 = vmor %vm227_vm0, %vm228_vm1 }
  0x52   : > { %v224_v13 = vsub.f32 1.0, %v223_v10  ;;  %vm244_vm6 = vmor %vm242_vm2, %vm243_vm3 }
  0x53   : > { %v239_v16 = vsub.f32 1.0, %v238_v12 }
  0x54   : > { %v225_v18 = vmul.f32 %v559_v8, %v224_v13 }
  0x55   : > { %v240_v21 = vmul.f32 %v561_v9, %v239_v16 }
  0x56   : > { %v226_v22 = vadd.f32 %v559_v8, %v225_v18 }
  0x57   : > { %v241_v24 = vadd.f32 %v561_v9, %v240_v21 }
  0x58   : > { %v230_v26 = vsel %vm229_vm4, %v559_v8, %v226_v22 }
  0x59   : > { %v235_v28 = vsel %vm232_vm5, %v234_v20, %v230_v26  ;;  %v245_v29 = vsel %vm244_vm6, %v561_v9, %v241_v24 }
  0x5a   : > { %300 = vrot.lane.b32.xlu0 %v235_v28, %s698_s20  ;;  %v250_v30 = vsel %vm247_vm7, %v249_v23, %v245_v29  ;;  %271 = vmatpush.msra.mxu0 %v235_v28 }
  0x5b   : > { %482 = vmatmul.msk.f32.vlgmr.msra.gmra.mxu0 %vm252_vm8, %v492_v25  ;;  %294 = vmatpush.msra.mxu1 %v250_v30 }
  0x5c   : > { %483 = vmatmul.msk.f32.vlgmr.msra.gmra.mxu1 %vm252_vm8, %v493_v27 }
  0x62   : > { %303 = vrot.lane.b32.xlu0 %v250_v30, %s698_s20 }
  0xcc   : > { %v301_v31 = vpop.permute.xlu0 %300 }
  0xcd   : > { %v302_v32 = vsel %vm299_vm9, %v301_v31, %v235_v28 }
  0xce   : > { %306 = vrot.lane.b32.xlu1 %v302_v32, %s698_s20 }
  0xd4   : > { %v304_v33 = vpop.permute.xlu0 %303 }
  0xd5   : > { %v305_v34 = vsel %vm299_vm9, %v304_v33, %v250_v30 }
  0xd6   : > { %308 = vrot.lane.b32.xlu1 %v305_v34, %s698_s20 }
  0xd8   : > { %v273_v35 = vpop.f32.mrf.mxu0 }
  0xd9   : > { %317 = vrot.lane.b32.xlu2 %v273_v35, %s699_s16  ;;  %v296_v36 = vpop.f32.mrf.mxu1 }
  0xe1   : > { %319 = vrot.lane.b32.xlu2 %v296_v36, %s699_s16 }
 0x133   : > { %v318_v37 = vpop.permute.xlu2 %317 }
 0x13b   : > { %v320_v41 = vpop.permute.xlu2 %319 }
 0x140   : > { %v307_v38 = vpop.permute.xlu1 %306 }
 0x141   : > { %v310_v39 = vsel %vm299_vm9, %v307_v38, %v235_v28 }
 0x142   : > { %v323_v40 = vsub.f32 %v310_v39, %v318_v37 }
 0x144   : > { %327 = vrot.lane.b32.xlu0 %v323_v40, %s700_s17 }
 0x148   : > { %v309_v42 = vpop.permute.xlu1 %308 }
 0x149   : > { %v311_v43 = vsel %vm299_vm9, %v309_v42, %v250_v30 }
 0x14a   : > { %v324_v44 = vsub.f32 %v311_v43, %v320_v41 }
 0x14c   : > { %329 = vrot.lane.b32.xlu1 %v324_v44, %s700_s17 }
 0x1b6   : > { %v328_v47 = vpop.permute.xlu0 %327 }
 0x1b7   : > { %v333_v48 = vsel %vm314_vm10, %v328_v47, 0.0 }
 0x1b8   : > { %v335_v49 = vmax.f32 %v333_v48, 0.0 }
 0x1ba   : > { %v338_v53 = vsel %vm337_vm11, %v335_v49, 0.0 }
 0x1be   : > { %v330_v50 = vpop.permute.xlu1 %329 }
 0x1bf   : > { %v334_v51 = vsel %vm314_vm10, %v330_v50, 0.0 }
 0x1c0   : > { %v336_v52 = vmax.f32 %v334_v51, 0.0 }
 0x1c2   : > { %v339_v54 = vsel %vm337_vm11, %v336_v52, 0.0 }
 0x1c3   : > { %v340_v55 = vadd.f32 %v339_v54, %v338_v53 }
 0x1c5   : > { %341 = vadd.xlane.f32.xlu2 %v340_v55 }
 0x238   : > { %v342_v56 = vpop.xlane.xlu2 %341 }
 0x239   : > { %v343_v57 = vrot.slane %v342_v56, 4 }
 0x23b   : > { %v344_v58 = vadd.f32 %v343_v57, %v342_v56 }
 0x23d   : > { %v345_v59 = vrot.slane %v344_v58, 2 }
 0x23f   : > { %v346_v60 = vadd.f32 %v345_v59, %v344_v58 }
 0x241   : > { %v347_v61 = vrot.slane %v346_v60, 1 }
 0x243   : > { %v348_v62 = vadd.f32 %v347_v61, %v346_v60 }
 0x245   : > { %494 = vpush %v348_v62 }
 0x276   : > { %s495_s23 = spop %494 }
 0x277   : > { %v355_v0 = vstv %s495_s23 }
 0x278   : > { %v356_v1 = vsel %vm354_vm14, %v355_v0, 0.0 }
 0x279   : > { %357 = vst [vmem:[%s205_s24] sm:$0xff] %v356_v1 }
 0x27a   : > { %649 = shalt.err (!%p646_p13)
}
 0x27b   : > { %500 = dma.vmem_to_hbm [thread:$0]  (%p765_p10), %s372_s25, 128, %s374_s28, %s359_s27  }
 0x27c PF: > { %p514_p0 = scmp.ge.s32.totalorder %s692_s12, 2  ;;  %s385_s30 = sand.u32 1, %s680_s9  }
 0x27d   : > { %s386_s20 = scalar_lea.sflag [#allocation4], %s385_s30 }
 0x27e   : > { %p510_p4 = pnand %p514_p0, %p769_p11 }
 0x280   : > { %p511_p5 = pneg %p510_p4 }
 0x282   : > { %675 = dma.done.wait (%p511_p5), %s386_s20, 128  }
 0x283   : > { %677 = vsyncadd (%p511_p5), %s386_s20, 4294967168  ;;  %p18_p7 = scmp.ge.s32.totalorder %s741_s15, 5   ;;  %s897_s9 = smov %s684_s10 }
 0x284   : > { %s898_s10 = smov %s688_s11  ;;  %s899_s11 = smov %s753_s18 }
 0x285   : > { %s900_s12 = smov %s741_s15  ;;  %20 = sbr.rel (!%p18_p7) target bundleno = 7 (0x7), region = 86 }
 0x28a   :  { %392 = vsyncpa [#allocation3], 1 }
 0x28b   :  { %394 = vsyncpa [#allocation3 + $0x1], 1 }
 0x28c   :  { %395 = vsyncpa [#allocation6], 1 }
 0x28d   :  { %397 = vsyncpa [#allocation6 + $0x1], 1 }
 0x28e   :  { %398 = vsyncpa [#allocation4], 1 }
 0x28f   :  { %400 = vsyncpa [#allocation4 + $0x1], 1 }

</bundles_post_ra>
